<compile_context>
chip_gen: v5e
topology: v5e:2x2
jax: 0.10.0
libtpu: 0.0.40
codegen_flags: <defaults>
</compile_context>

<pallas_src>
import functools

import jax
import jax.numpy as jnp
import numpy as np
from jax.experimental import pallas as pl
from jax.experimental.pallas import tpu as pltpu


def _gatnet_kernel(srcc_ref, dstc_ref, dstr_ref,
                   left_ref, right_ref, efeat_ref,
                   W_ref, Wa_src_ref, Wa_dst_ref, Wa_edge_ref,
                   bconv_ref, Wlt_ref, blt_ref, Wfmf_ref, bfmf_ref,
                   Wp_ref, bp_ref,
                   out_ref, alpha_ref,
                   *, E, Ns, Nd, H, C):
    f32 = jnp.float32

    def head_expand(a, rows):
        # [rows, H] -> [rows, H*C]; whole-tile op, hoisted out of any per-edge work.
        return jnp.concatenate(
            [jnp.broadcast_to(a[:, h:h + 1], (rows, C)) for h in range(H)], axis=1)

    # ---- Phase 0: dense projections ------------------------------------------------
    # Big projection on the MXU in bf16 (exact: inputs are bf16-rounded, f32 acc).
    xs = jnp.dot(left_ref[...], W_ref[...], preferred_element_type=f32)      # [Ns, HC]
    left_f = left_ref[...].astype(f32)
    right_f = right_ref[...].astype(f32)
    # H-wide attention-logit dots stay f32 (tiny K; alpha is externally visible).
    a_src = jnp.dot(left_f, Wa_src_ref[...], preferred_element_type=f32)     # [Ns, H]
    a_dst = jnp.dot(right_f, Wa_dst_ref[...], preferred_element_type=f32)    # [Nd, H]
    a_edge = jnp.dot(efeat_ref[...].astype(f32), Wa_edge_ref[...],
                     preferred_element_type=f32)                             # [E, H]

    # ---- In-register one-hot incidence tiles (never materialized in HBM) -----------
    src_col = srcc_ref[...]                                                  # [E, 1]
    dst_col = dstc_ref[...]                                                  # [E, 1]
    dst_row = dstr_ref[...]                                                  # [1, E]
    S = (jax.lax.broadcasted_iota(jnp.int32, (E, Ns), 1) == src_col).astype(f32)
    dmask = jax.lax.broadcasted_iota(jnp.int32, (E, Nd), 1) == dst_col       # [E, Nd]
    Dm = dmask.astype(f32)                                                   # [E, Nd]
    DmT = (jax.lax.broadcasted_iota(jnp.int32, (Nd, E), 0) == dst_row).astype(f32)

    # ---- Phase 1: gathers + per-destination online-safe softmax (whole tiles) ------
    xs_g = jnp.dot(S, xs, preferred_element_type=f32)                        # [E, HC]
    logit = (jnp.dot(S, a_src, preferred_element_type=f32)
             + jnp.dot(Dm, a_dst, preferred_element_type=f32)
             + a_edge)                                                       # [E, H]
    logit = jnp.where(logit > 0, logit, 0.2 * logit)                         # leaky_relu

    # Per-destination segment max via masked sublane reductions, then an exact
    # per-edge gather (one-hot row-select as a masked lane-sum).
    m_cols = []
    for h in range(H):
        lg_b = jnp.broadcast_to(logit[:, h:h + 1], (E, Nd))                  # [E, Nd]
        masked = jnp.where(dmask, lg_b, -1e30)
        m_row = jnp.max(masked, axis=0, keepdims=True)                       # [1, Nd]
        m_g_h = jnp.sum(Dm * jnp.broadcast_to(m_row, (E, Nd)),
                        axis=1, keepdims=True)                               # [E, 1]
        m_cols.append(m_g_h)
    m_g = jnp.concatenate(m_cols, axis=1)                                    # [E, H]

    p = jnp.exp(logit - m_g)                                                 # [E, H]
    l = jnp.dot(DmT, p, preferred_element_type=f32)                          # [Nd, H]
    l_g = jnp.dot(Dm, l, preferred_element_type=f32)                         # [E, H]
    # Exact division for the externally visible attention weights.
    alpha_ref[...] = p / l_g

    # ---- Phase 2: message aggregation as a single one-hot MXU matmul ----------------
    weighted = head_expand(p, E) * xs_g                                      # [E, HC]
    acc = jnp.dot(DmT, weighted, preferred_element_type=f32)                 # [Nd, HC]
    l_b = head_expand(l, Nd)                                                 # [Nd, HC]
    # Zero in-degree nodes: acc row == 0 -> conv == b_conv (matches segment_sum).
    conv = acc / jnp.where(l_b > 0, l_b, 1.0) + bconv_ref[...]               # [Nd, HC]

    # ---- Phase 3: MLP head (fused post_concat matmul) -------------------------------
    h1 = jnp.maximum(conv, 0.0)                                              # x.relu()
    h1 = jnp.dot(h1, Wlt_ref[...], preferred_element_type=f32) + blt_ref[...]
    h1 = jnp.maximum(h1, 0.0)                                                # activation
    h1 = jnp.dot(h1, Wfmf_ref[...], preferred_element_type=f32) + bfmf_ref[...]
    out_ref[...] = (jnp.dot(jnp.concatenate([right_f, h1], axis=1), Wp_ref[...],
                            preferred_element_type=f32) + bp_ref[...])


def gatnet_forward(left, right, edge_index, efeat, params):
    Ns, IN = left.shape
    Nd = right.shape[0]
    E = edge_index.shape[1]
    H, C = params["att_src"].shape
    f32, bf16 = jnp.float32, jnp.bfloat16

    src = edge_index[0].astype(jnp.int32)
    dst = edge_index[1].astype(jnp.int32)
    src_col = src.reshape(E, 1)
    dst_col = dst.reshape(E, 1)
    dst_row = dst.reshape(1, E)

    leftb = left.astype(bf16)
    rightb = right.astype(bf16)
    efeatb = efeat.astype(bf16)
    Wb = params["W"].astype(bf16)

    # Fold per-head attention vectors into the projection weights (exact in real
    # arithmetic): a_src[n, h] = sum_c (left@W)[n, h*C+c] * att_src[h, c]
    #                          = left[n] @ Wa_src[:, h].   Kept in f32 for alpha accuracy.
    W_r = Wb.astype(f32).reshape(IN, H, C)
    We_r = params["We"].astype(bf16).astype(f32).reshape(efeat.shape[1], H, C)
    Wa_src = jnp.einsum("ihc,hc->ih", W_r, params["att_src"].astype(f32))
    Wa_dst = jnp.einsum("ihc,hc->ih", W_r, params["att_dst"].astype(f32))
    Wa_edge = jnp.einsum("ihc,hc->ih", We_r, params["att_edge"].astype(f32))

    # Fused post_concat weight: cat([right, x], -1) @ Wp == right @ Wp_r + x @ Wp_x.
    Wp = jnp.concatenate([params["Wp_r"], params["Wp_x"]], axis=0).astype(f32)

    kernel = functools.partial(_gatnet_kernel, E=E, Ns=Ns, Nd=Nd, H=H, C=C)
    vmem = pl.BlockSpec(memory_space=pltpu.MemorySpace.VMEM)

    out, alpha = pl.pallas_call(
        kernel,
        out_shape=(jax.ShapeDtypeStruct((Nd, C), f32),
                   jax.ShapeDtypeStruct((E, H), f32)),
        in_specs=[vmem] * 17,
        out_specs=(vmem, vmem),
        # Sized well below v7x's 64 MiB per-TC VMEM (everything here is one tile).
        compiler_params=pltpu.CompilerParams(vmem_limit_bytes=48 * 1024 * 1024),
    )(src_col, dst_col, dst_row, leftb, rightb, efeatb, Wb,
      Wa_src, Wa_dst, Wa_edge,
      params["b_conv"], params["W_lt"], params["b_lt"],
      params["W_fmf"], params["b_fmf"], Wp, params["b_p"])
    # Matches `return (left_features_updated, _)` with _ = (edge_index, alpha).
    return out, (edge_index, alpha)


def reference(left, right, edge_index, efeat, params):
    """Pure-JAX reference of the PyG GATConv + MLP head (bf16-rounded inputs)."""
    hp = jax.lax.Precision.HIGHEST
    rt = lambda a: a.astype(jnp.bfloat16).astype(jnp.float32)
    left, right, efeat = rt(left), rt(right), rt(efeat)
    W, We = rt(params["W"]), rt(params["We"])
    src, dst = edge_index[0], edge_index[1]
    Ns, Nd, E = left.shape[0], right.shape[0], src.shape[0]
    H, C = params["att_src"].shape
    xs = jnp.dot(left, W, precision=hp).reshape(Ns, H, C)
    xd = jnp.dot(right, W, precision=hp).reshape(Nd, H, C)
    xe = jnp.dot(efeat, We, precision=hp).reshape(E, H, C)
    a_src = (xs * params["att_src"]).sum(-1)
    a_dst = (xd * params["att_dst"]).sum(-1)
    a_edge = (xe * params["att_edge"]).sum(-1)
    alpha = a_src[src] + a_dst[dst] + a_edge
    alpha = jnp.where(alpha > 0, alpha, 0.2 * alpha)
    m = jax.ops.segment_max(alpha, dst, num_segments=Nd)[dst]
    ex = jnp.exp(alpha - m)
    den = jax.ops.segment_sum(ex, dst, num_segments=Nd)[dst]
    attn = ex / den
    msg = xs[src] * attn[..., None]
    conv = jax.ops.segment_sum(msg.reshape(E, H * C), dst, num_segments=Nd) + params["b_conv"][0]
    h = jax.nn.relu(conv)
    h = jnp.dot(h, params["W_lt"], precision=hp) + params["b_lt"][0]
    h = jax.nn.relu(h)
    h = jnp.dot(h, params["W_fmf"], precision=hp) + params["b_fmf"][0]
    Wp = jnp.concatenate([params["Wp_r"], params["Wp_x"]], axis=0)
    out = jnp.dot(jnp.concatenate([right, h], axis=-1), Wp, precision=hp) + params["b_p"][0]
    return out, attn


if __name__ == "__main__":
    # Module hyper-params: in_channels == out_channels required by the forward's
    # cat((right_features, x)) -> Linear(out_channels*2, out_channels).
    IN_CH = OUT_CH = 16
    HEADS = 2
    EDGE_DIM = OUT_CH
    N_LEFT, N_RIGHT, N_EDGES = 8, 8, 16

    key = jax.random.PRNGKey(0)
    ks = jax.random.split(key, 16)
    f32 = jnp.float32

    left = jax.random.normal(ks[0], (N_LEFT, IN_CH), f32)
    right = jax.random.normal(ks[1], (N_RIGHT, IN_CH), f32)
    efeat = jax.random.normal(ks[2], (N_EDGES, EDGE_DIM), f32)
    src = jax.random.randint(ks[3], (N_EDGES,), 0, N_LEFT)
    dst = jax.random.randint(ks[4], (N_EDGES,), 0, N_RIGHT)
    edge_index = jnp.stack([src, dst], axis=0)  # [2, E]

    H, C = HEADS, OUT_CH
    params = {
        # GATConv
        "W":        0.1 * jax.random.normal(ks[5], (IN_CH, H * C), f32),      # shared lin_src/lin_dst
        "We":       0.1 * jax.random.normal(ks[6], (EDGE_DIM, H * C), f32),   # lin_edge (no bias)
        "att_src":  0.1 * jax.random.normal(ks[7], (H, C), f32),
        "att_dst":  0.1 * jax.random.normal(ks[8], (H, C), f32),
        "att_edge": 0.1 * jax.random.normal(ks[9], (H, C), f32),
        "b_conv":   0.1 * jax.random.normal(ks[10], (1, H * C), f32),
        # linear_transform: Linear(H*C -> C)
        "W_lt":     0.1 * jax.random.normal(ks[11], (H * C, C), f32),
        "b_lt":     0.1 * jax.random.normal(ks[12], (1, C), f32),
        # feature_module_final: ReLU -> Linear(C -> C)
        "W_fmf":    0.1 * jax.random.normal(ks[13], (C, C), f32),
        "b_fmf":    0.1 * jax.random.normal(ks[14], (1, C), f32),
        # post_concat: Linear(2C -> C), split as [right | x] blocks
        "Wp_r":     0.1 * jax.random.normal(ks[15], (IN_CH, C), f32),
        "Wp_x":     0.1 * jax.random.normal(jax.random.fold_in(key, 99), (C, C), f32),
        "b_p":      0.1 * jax.random.normal(jax.random.fold_in(key, 100), (1, C), f32),
    }

    out, (ei, alpha) = gatnet_forward(left, right, edge_index, efeat, params)
    jax.block_until_ready(out)
    jax.block_until_ready(alpha)

    ref_out, ref_alpha = reference(left, right, edge_index, efeat, params)
    # Tolerances allow for matmul-precision-mode differences between XLA and Mosaic.
    np.testing.assert_allclose(np.asarray(out), np.asarray(ref_out), rtol=5e-3, atol=2e-3)
    np.testing.assert_allclose(np.asarray(alpha), np.asarray(ref_alpha), rtol=5e-3, atol=1e-3)

    print("KERNEL_OK")
</pallas_src>

<mosaic_0001>
module attributes {stable_mosaic.version = 11 : i64} {
  func.func @_gatnet_kernel(%arg0: memref<16x1xi32, #tpu.memory_space<vmem>>, %arg1: memref<16x1xi32, #tpu.memory_space<vmem>>, %arg2: memref<1x16xi32, #tpu.memory_space<vmem>>, %arg3: memref<8x16xbf16, #tpu.memory_space<vmem>>, %arg4: memref<8x16xbf16, #tpu.memory_space<vmem>>, %arg5: memref<16x16xbf16, #tpu.memory_space<vmem>>, %arg6: memref<16x32xbf16, #tpu.memory_space<vmem>>, %arg7: memref<16x2xf32, #tpu.memory_space<vmem>>, %arg8: memref<16x2xf32, #tpu.memory_space<vmem>>, %arg9: memref<16x2xf32, #tpu.memory_space<vmem>>, %arg10: memref<1x32xf32, #tpu.memory_space<vmem>>, %arg11: memref<32x16xf32, #tpu.memory_space<vmem>>, %arg12: memref<1x16xf32, #tpu.memory_space<vmem>>, %arg13: memref<16x16xf32, #tpu.memory_space<vmem>>, %arg14: memref<1x16xf32, #tpu.memory_space<vmem>>, %arg15: memref<32x16xf32, #tpu.memory_space<vmem>>, %arg16: memref<1x16xf32, #tpu.memory_space<vmem>>, %arg17: memref<8x16xf32, #tpu.memory_space<vmem>>, %arg18: memref<16x2xf32, #tpu.memory_space<vmem>>) attributes {dimension_semantics = [], scalar_prefetch = 0 : i64, scratch_operands = 0 : i64, tpu.core_type = #tpu.core_type<tc>} {
    %c0 = arith.constant 0 : index
    %c0_0 = arith.constant 0 : index
    %0 = vector.load %arg3[%c0, %c0_0] : memref<8x16xbf16, #tpu.memory_space<vmem>>, vector<8x16xbf16>
    %c0_1 = arith.constant 0 : index
    %c0_2 = arith.constant 0 : index
    %1 = vector.load %arg6[%c0_1, %c0_2] : memref<16x32xbf16, #tpu.memory_space<vmem>>, vector<16x32xbf16>
    %cst = arith.constant dense<0.000000e+00> : vector<8x32xf32>
    %2 = tpu.matmul %0, %1, %cst {dimension_numbers = #tpu.dot_dimension_numbers<[1], [0], [0], [1], [0, 0, 1, 1], [], []>} : vector<8x16xbf16>, vector<16x32xbf16>, vector<8x32xf32> -> vector<8x32xf32>
    %c0_3 = arith.constant 0 : index
    %c0_4 = arith.constant 0 : index
    %3 = vector.load %arg3[%c0_3, %c0_4] : memref<8x16xbf16, #tpu.memory_space<vmem>>, vector<8x16xbf16>
    %4 = arith.extf %3 : vector<8x16xbf16> to vector<8x16xf32>
    %c0_5 = arith.constant 0 : index
    %c0_6 = arith.constant 0 : index
    %5 = vector.load %arg4[%c0_5, %c0_6] : memref<8x16xbf16, #tpu.memory_space<vmem>>, vector<8x16xbf16>
    %6 = arith.extf %5 : vector<8x16xbf16> to vector<8x16xf32>
    %c0_7 = arith.constant 0 : index
    %c0_8 = arith.constant 0 : index
    %7 = vector.load %arg7[%c0_7, %c0_8] : memref<16x2xf32, #tpu.memory_space<vmem>>, vector<16x2xf32>
    %cst_9 = arith.constant dense<0.000000e+00> : vector<8x2xf32>
    %8 = tpu.matmul %4, %7, %cst_9 {dimension_numbers = #tpu.dot_dimension_numbers<[1], [0], [0], [1], [0, 0, 1, 1], [], []>} : vector<8x16xf32>, vector<16x2xf32>, vector<8x2xf32> -> vector<8x2xf32>
    %c0_10 = arith.constant 0 : index
    %c0_11 = arith.constant 0 : index
    %9 = vector.load %arg8[%c0_10, %c0_11] : memref<16x2xf32, #tpu.memory_space<vmem>>, vector<16x2xf32>
    %cst_12 = arith.constant dense<0.000000e+00> : vector<8x2xf32>
    %10 = tpu.matmul %6, %9, %cst_12 {dimension_numbers = #tpu.dot_dimension_numbers<[1], [0], [0], [1], [0, 0, 1, 1], [], []>} : vector<8x16xf32>, vector<16x2xf32>, vector<8x2xf32> -> vector<8x2xf32>
    %c0_13 = arith.constant 0 : index
    %c0_14 = arith.constant 0 : index
    %11 = vector.load %arg5[%c0_13, %c0_14] : memref<16x16xbf16, #tpu.memory_space<vmem>>, vector<16x16xbf16>
    %12 = arith.extf %11 : vector<16x16xbf16> to vector<16x16xf32>
    %c0_15 = arith.constant 0 : index
    %c0_16 = arith.constant 0 : index
    %13 = vector.load %arg9[%c0_15, %c0_16] : memref<16x2xf32, #tpu.memory_space<vmem>>, vector<16x2xf32>
    %cst_17 = arith.constant dense<0.000000e+00> : vector<16x2xf32>
    %14 = tpu.matmul %12, %13, %cst_17 {dimension_numbers = #tpu.dot_dimension_numbers<[1], [0], [0], [1], [0, 0, 1, 1], [], []>} : vector<16x16xf32>, vector<16x2xf32>, vector<16x2xf32> -> vector<16x2xf32>
    %c0_18 = arith.constant 0 : index
    %c0_19 = arith.constant 0 : index
    %15 = vector.load %arg0[%c0_18, %c0_19] : memref<16x1xi32, #tpu.memory_space<vmem>>, vector<16x1xi32>
    %c0_20 = arith.constant 0 : index
    %c0_21 = arith.constant 0 : index
    %16 = vector.load %arg1[%c0_20, %c0_21] : memref<16x1xi32, #tpu.memory_space<vmem>>, vector<16x1xi32>
    %c0_22 = arith.constant 0 : index
    %c0_23 = arith.constant 0 : index
    %17 = vector.load %arg2[%c0_22, %c0_23] : memref<1x16xi32, #tpu.memory_space<vmem>>, vector<1x16xi32>
    %18 = tpu.iota {dimensions = array<i32: 1>} : vector<16x8xi32>
    %19 = vector.broadcast %15 : vector<16x1xi32> to vector<16x8xi32>
    %20 = arith.cmpi eq, %18, %19 : vector<16x8xi32>
    %21 = arith.extui %20 : vector<16x8xi1> to vector<16x8xi32>
    %22 = arith.sitofp %21 : vector<16x8xi32> to vector<16x8xf32>
    %23 = tpu.iota {dimensions = array<i32: 1>} : vector<16x8xi32>
    %24 = vector.broadcast %16 : vector<16x1xi32> to vector<16x8xi32>
    %25 = arith.cmpi eq, %23, %24 : vector<16x8xi32>
    %26 = arith.extui %25 : vector<16x8xi1> to vector<16x8xi32>
    %27 = arith.sitofp %26 : vector<16x8xi32> to vector<16x8xf32>
    %28 = tpu.iota {dimensions = array<i32: 0>} : vector<8x16xi32>
    %29 = vector.broadcast %17 : vector<1x16xi32> to vector<8x16xi32>
    %30 = arith.cmpi eq, %28, %29 : vector<8x16xi32>
    %31 = arith.extui %30 : vector<8x16xi1> to vector<8x16xi32>
    %32 = arith.sitofp %31 : vector<8x16xi32> to vector<8x16xf32>
    %cst_24 = arith.constant dense<0.000000e+00> : vector<16x32xf32>
    %33 = tpu.matmul %22, %2, %cst_24 {dimension_numbers = #tpu.dot_dimension_numbers<[1], [0], [0], [1], [0, 0, 1, 1], [], []>} : vector<16x8xf32>, vector<8x32xf32>, vector<16x32xf32> -> vector<16x32xf32>
    %cst_25 = arith.constant dense<0.000000e+00> : vector<16x2xf32>
    %34 = tpu.matmul %22, %8, %cst_25 {dimension_numbers = #tpu.dot_dimension_numbers<[1], [0], [0], [1], [0, 0, 1, 1], [], []>} : vector<16x8xf32>, vector<8x2xf32>, vector<16x2xf32> -> vector<16x2xf32>
    %cst_26 = arith.constant dense<0.000000e+00> : vector<16x2xf32>
    %35 = tpu.matmul %27, %10, %cst_26 {dimension_numbers = #tpu.dot_dimension_numbers<[1], [0], [0], [1], [0, 0, 1, 1], [], []>} : vector<16x8xf32>, vector<8x2xf32>, vector<16x2xf32> -> vector<16x2xf32>
    %36 = arith.addf %34, %35 : vector<16x2xf32>
    %37 = arith.addf %36, %14 : vector<16x2xf32>
    %cst_27 = arith.constant 0.000000e+00 : f32
    %38 = vector.broadcast %cst_27 : f32 to vector<16x2xf32>
    %39 = arith.cmpf ogt, %37, %38 : vector<16x2xf32>
    %cst_28 = arith.constant 2.000000e-01 : f32
    %40 = vector.broadcast %cst_28 : f32 to vector<16x2xf32>
    %41 = arith.mulf %40, %37 : vector<16x2xf32>
    %42 = arith.select %39, %37, %41 : vector<16x2xi1>, vector<16x2xf32>
    %43 = vector.extract_strided_slice %42 {offsets = [0, 0], sizes = [16, 1], strides = [1, 1]} : vector<16x2xf32> to vector<16x1xf32>
    %44 = vector.shape_cast %43 : vector<16x1xf32> to vector<16x1xf32>
    %45 = vector.broadcast %44 : vector<16x1xf32> to vector<16x8xf32>
    %cst_29 = arith.constant -1.000000e+30 : f32
    %46 = vector.broadcast %cst_29 : f32 to vector<16x8xf32>
    %47 = arith.select %25, %45, %46 : vector<16x8xi1>, vector<16x8xf32>
    %cst_30 = arith.constant dense<0xFF800000> : vector<8xf32>
    %48 = vector.multi_reduction <maximumf>, %47, %cst_30 [0] : vector<16x8xf32> to vector<8xf32>
    %49 = vector.shape_cast %48 : vector<8xf32> to vector<1x8xf32>
    %50 = vector.shape_cast %49 : vector<1x8xf32> to vector<1x8xf32>
    %51 = vector.broadcast %50 : vector<1x8xf32> to vector<16x8xf32>
    %52 = arith.mulf %27, %51 : vector<16x8xf32>
    %cst_31 = arith.constant dense<0.000000e+00> : vector<16xf32>
    %53 = vector.multi_reduction <add>, %52, %cst_31 [1] : vector<16x8xf32> to vector<16xf32>
    %54 = vector.shape_cast %53 : vector<16xf32> to vector<16x1xf32>
    %55 = vector.extract_strided_slice %42 {offsets = [0, 1], sizes = [16, 1], strides = [1, 1]} : vector<16x2xf32> to vector<16x1xf32>
    %56 = vector.shape_cast %55 : vector<16x1xf32> to vector<16x1xf32>
    %57 = vector.broadcast %56 : vector<16x1xf32> to vector<16x8xf32>
    %cst_32 = arith.constant -1.000000e+30 : f32
    %58 = vector.broadcast %cst_32 : f32 to vector<16x8xf32>
    %59 = arith.select %25, %57, %58 : vector<16x8xi1>, vector<16x8xf32>
    %cst_33 = arith.constant dense<0xFF800000> : vector<8xf32>
    %60 = vector.multi_reduction <maximumf>, %59, %cst_33 [0] : vector<16x8xf32> to vector<8xf32>
    %61 = vector.shape_cast %60 : vector<8xf32> to vector<1x8xf32>
    %62 = vector.shape_cast %61 : vector<1x8xf32> to vector<1x8xf32>
    %63 = vector.broadcast %62 : vector<1x8xf32> to vector<16x8xf32>
    %64 = arith.mulf %27, %63 : vector<16x8xf32>
    %cst_34 = arith.constant dense<0.000000e+00> : vector<16xf32>
    %65 = vector.multi_reduction <add>, %64, %cst_34 [1] : vector<16x8xf32> to vector<16xf32>
    %66 = vector.shape_cast %65 : vector<16xf32> to vector<16x1xf32>
    %67 = tpu.concatenate %54, %66 in 1 : vector<16x1xf32>, vector<16x1xf32> -> vector<16x2xf32>
    %68 = arith.subf %42, %67 : vector<16x2xf32>
    %69 = math.exp %68 : vector<16x2xf32>
    %cst_35 = arith.constant dense<0.000000e+00> : vector<8x2xf32>
    %70 = tpu.matmul %32, %69, %cst_35 {dimension_numbers = #tpu.dot_dimension_numbers<[1], [0], [0], [1], [0, 0, 1, 1], [], []>} : vector<8x16xf32>, vector<16x2xf32>, vector<8x2xf32> -> vector<8x2xf32>
    %cst_36 = arith.constant dense<0.000000e+00> : vector<16x2xf32>
    %71 = tpu.matmul %27, %70, %cst_36 {dimension_numbers = #tpu.dot_dimension_numbers<[1], [0], [0], [1], [0, 0, 1, 1], [], []>} : vector<16x8xf32>, vector<8x2xf32>, vector<16x2xf32> -> vector<16x2xf32>
    %72 = arith.divf %69, %71 : vector<16x2xf32>
    %c0_37 = arith.constant 0 : index
    %c0_38 = arith.constant 0 : index
    %73 = vector.load %arg18[%c0_37, %c0_38] : memref<16x2xf32, #tpu.memory_space<vmem>>, vector<16x2xf32>
    tpu.vector_store %arg18[%c0_37, %c0_38], %72 {strides = array<i32>} : memref<16x2xf32, #tpu.memory_space<vmem>>, vector<16x2xf32>,
    %74 = vector.extract_strided_slice %69 {offsets = [0, 0], sizes = [16, 1], strides = [1, 1]} : vector<16x2xf32> to vector<16x1xf32>
    %75 = vector.shape_cast %74 : vector<16x1xf32> to vector<16x1xf32>
    %76 = vector.broadcast %75 : vector<16x1xf32> to vector<16x16xf32>
    %77 = vector.extract_strided_slice %69 {offsets = [0, 1], sizes = [16, 1], strides = [1, 1]} : vector<16x2xf32> to vector<16x1xf32>
    %78 = vector.shape_cast %77 : vector<16x1xf32> to vector<16x1xf32>
    %79 = vector.broadcast %78 : vector<16x1xf32> to vector<16x16xf32>
    %80 = tpu.concatenate %76, %79 in 1 : vector<16x16xf32>, vector<16x16xf32> -> vector<16x32xf32>
    %81 = arith.mulf %80, %33 : vector<16x32xf32>
    %cst_39 = arith.constant dense<0.000000e+00> : vector<8x32xf32>
    %82 = tpu.matmul %32, %81, %cst_39 {dimension_numbers = #tpu.dot_dimension_numbers<[1], [0], [0], [1], [0, 0, 1, 1], [], []>} : vector<8x16xf32>, vector<16x32xf32>, vector<8x32xf32> -> vector<8x32xf32>
    %83 = vector.extract_strided_slice %70 {offsets = [0, 0], sizes = [8, 1], strides = [1, 1]} : vector<8x2xf32> to vector<8x1xf32>
    %84 = vector.shape_cast %83 : vector<8x1xf32> to vector<8x1xf32>
    %85 = vector.broadcast %84 : vector<8x1xf32> to vector<8x16xf32>
    %86 = vector.extract_strided_slice %70 {offsets = [0, 1], sizes = [8, 1], strides = [1, 1]} : vector<8x2xf32> to vector<8x1xf32>
    %87 = vector.shape_cast %86 : vector<8x1xf32> to vector<8x1xf32>
    %88 = vector.broadcast %87 : vector<8x1xf32> to vector<8x16xf32>
    %89 = tpu.concatenate %85, %88 in 1 : vector<8x16xf32>, vector<8x16xf32> -> vector<8x32xf32>
    %cst_40 = arith.constant 0.000000e+00 : f32
    %90 = vector.broadcast %cst_40 : f32 to vector<8x32xf32>
    %91 = arith.cmpf ogt, %89, %90 : vector<8x32xf32>
    %cst_41 = arith.constant 1.000000e+00 : f32
    %92 = vector.broadcast %cst_41 : f32 to vector<8x32xf32>
    %93 = arith.select %91, %89, %92 : vector<8x32xi1>, vector<8x32xf32>
    %94 = arith.divf %82, %93 : vector<8x32xf32>
    %c0_42 = arith.constant 0 : index
    %c0_43 = arith.constant 0 : index
    %95 = vector.load %arg10[%c0_42, %c0_43] : memref<1x32xf32, #tpu.memory_space<vmem>>, vector<1x32xf32>
    %96 = vector.broadcast %95 : vector<1x32xf32> to vector<8x32xf32>
    %97 = arith.addf %94, %96 : vector<8x32xf32>
    %cst_44 = arith.constant 0.000000e+00 : f32
    %98 = vector.broadcast %cst_44 : f32 to vector<8x32xf32>
    %99 = arith.maximumf %97, %98 : vector<8x32xf32>
    %c0_45 = arith.constant 0 : index
    %c0_46 = arith.constant 0 : index
    %100 = vector.load %arg11[%c0_45, %c0_46] : memref<32x16xf32, #tpu.memory_space<vmem>>, vector<32x16xf32>
    %cst_47 = arith.constant dense<0.000000e+00> : vector<8x16xf32>
    %101 = tpu.matmul %99, %100, %cst_47 {dimension_numbers = #tpu.dot_dimension_numbers<[1], [0], [0], [1], [0, 0, 1, 1], [], []>} : vector<8x32xf32>, vector<32x16xf32>, vector<8x16xf32> -> vector<8x16xf32>
    %c0_48 = arith.constant 0 : index
    %c0_49 = arith.constant 0 : index
    %102 = vector.load %arg12[%c0_48, %c0_49] : memref<1x16xf32, #tpu.memory_space<vmem>>, vector<1x16xf32>
    %103 = vector.broadcast %102 : vector<1x16xf32> to vector<8x16xf32>
    %104 = arith.addf %101, %103 : vector<8x16xf32>
    %cst_50 = arith.constant 0.000000e+00 : f32
    %105 = vector.broadcast %cst_50 : f32 to vector<8x16xf32>
    %106 = arith.maximumf %104, %105 : vector<8x16xf32>
    %c0_51 = arith.constant 0 : index
    %c0_52 = arith.constant 0 : index
    %107 = vector.load %arg13[%c0_51, %c0_52] : memref<16x16xf32, #tpu.memory_space<vmem>>, vector<16x16xf32>
    %cst_53 = arith.constant dense<0.000000e+00> : vector<8x16xf32>
    %108 = tpu.matmul %106, %107, %cst_53 {dimension_numbers = #tpu.dot_dimension_numbers<[1], [0], [0], [1], [0, 0, 1, 1], [], []>} : vector<8x16xf32>, vector<16x16xf32>, vector<8x16xf32> -> vector<8x16xf32>
    %c0_54 = arith.constant 0 : index
    %c0_55 = arith.constant 0 : index
    %109 = vector.load %arg14[%c0_54, %c0_55] : memref<1x16xf32, #tpu.memory_space<vmem>>, vector<1x16xf32>
    %110 = vector.broadcast %109 : vector<1x16xf32> to vector<8x16xf32>
    %111 = arith.addf %108, %110 : vector<8x16xf32>
    %112 = tpu.concatenate %6, %111 in 1 : vector<8x16xf32>, vector<8x16xf32> -> vector<8x32xf32>
    %c0_56 = arith.constant 0 : index
    %c0_57 = arith.constant 0 : index
    %113 = vector.load %arg15[%c0_56, %c0_57] : memref<32x16xf32, #tpu.memory_space<vmem>>, vector<32x16xf32>
    %cst_58 = arith.constant dense<0.000000e+00> : vector<8x16xf32>
    %114 = tpu.matmul %112, %113, %cst_58 {dimension_numbers = #tpu.dot_dimension_numbers<[1], [0], [0], [1], [0, 0, 1, 1], [], []>} : vector<8x32xf32>, vector<32x16xf32>, vector<8x16xf32> -> vector<8x16xf32>
    %c0_59 = arith.constant 0 : index
    %c0_60 = arith.constant 0 : index
    %115 = vector.load %arg16[%c0_59, %c0_60] : memref<1x16xf32, #tpu.memory_space<vmem>>, vector<1x16xf32>
    %116 = vector.broadcast %115 : vector<1x16xf32> to vector<8x16xf32>
    %117 = arith.addf %114, %116 : vector<8x16xf32>
    %c0_61 = arith.constant 0 : index
    %c0_62 = arith.constant 0 : index
    %118 = vector.load %arg17[%c0_61, %c0_62] : memref<8x16xf32, #tpu.memory_space<vmem>>, vector<8x16xf32>
    tpu.vector_store %arg17[%c0_61, %c0_62], %117 {strides = array<i32>} : memref<8x16xf32, #tpu.memory_space<vmem>>, vector<8x16xf32>,
    return
  }
}

</mosaic_0001>

<bundles_post_ra>
// kernel: tpu_custom_call.1
= control target key start
LH: loop header
LB: loop body
LE: loop exit
PB: predicated region body
PF: predicated region fallthrough
CT: control target
= control target key end

     0   :  { %s1032_s0 = inlined_call_operand.vmem [shape: s32[16,1], index: 0, kind: input, shape index: {}]   ;;  %s1033_s1 = inlined_call_operand.vmem [shape: s32[16,1], index: 1, kind: input, shape index: {}]   ;;  %s1034_s2 = inlined_call_operand.vmem [shape: s32[1,16], index: 2, kind: input, shape index: {}]   ;;  %s1035_s3 = inlined_call_operand.vmem [shape: bf16[8,16], index: 3, kind: input, shape index: {}]   ;;  %s1036_s4 = inlined_call_operand.vmem [shape: bf16[8,16], index: 4, kind: input, shape index: {}]   ;;  %s1037_s5 = inlined_call_operand.vmem [shape: bf16[16,16], index: 5, kind: input, shape index: {}]   ;;  %s1038_s6 = inlined_call_operand.vmem [shape: bf16[16,32], index: 6, kind: input, shape index: {}]   ;;  %s1039_s7 = inlined_call_operand.vmem [shape: f32[16,2], index: 7, kind: input, shape index: {}]   ;;  %s1040_s8 = inlined_call_operand.vmem [shape: f32[16,2], index: 8, kind: input, shape index: {}]   ;;  %s1041_s9 = inlined_call_operand.vmem [shape: f32[16,2], index: 9, kind: input, shape index: {}]   ;;  %s1042_s10 = inlined_call_operand.vmem [shape: f32[1,32], index: 10, kind: input, shape index: {}]   ;;  %s1043_s11 = inlined_call_operand.vmem [shape: f32[32,16], index: 11, kind: input, shape index: {}]   ;;  %s1044_s12 = inlined_call_operand.vmem [shape: f32[1,16], index: 12, kind: input, shape index: {}]   ;;  %s1045_s13 = inlined_call_operand.vmem [shape: f32[16,16], index: 13, kind: input, shape index: {}]   ;;  %s1046_s14 = inlined_call_operand.vmem [shape: f32[1,16], index: 14, kind: input, shape index: {}]   ;;  %s1047_s15 = inlined_call_operand.vmem [shape: f32[32,16], index: 15, kind: input, shape index: {}]   ;;  %s1048_s16 = inlined_call_operand.vmem [shape: f32[1,16], index: 16, kind: input, shape index: {}]   ;;  %s1049_s17 = inlined_call_operand.hbm [shape: f32[8,16], index: 17, kind: output, shape index: {0}]   ;;  %s1050_s18 = inlined_call_operand.vmem [shape: f32[16,2], index: 18, kind: output, shape index: {1}]  }
   0x1   :  { %1053 = sst [smem:[#allocation5_spill]] %s1032_s0 }
   0x2   :  { %1054 = sst [smem:[#allocation6_spill]] %s1033_s1 }
   0x3   :  { %1055 = sst [smem:[#allocation7_spill]] %s1034_s2 }
   0x4   :  { %v115_v0 = vld [vmem:[%s1040_s8 + $0x8] sm:$0xff]  ;;  %v114_v1 = vld [vmem:[%s1040_s8] sm:$0xff]  ;;  %vm69_vm0 = vcmask 130048   ;;  %v726_v7 = vmov 0   ;;  %s1056_s26 = sld [smem:[#allocation6_spill]] }
   0x5   :  { %v835_v2 = vld [vmem:[%s1036_s4] sm:$0xf]  ;;  %133 = vmatpush.msra.mxu2 %v115_v0  ;;  %v90_v5 = vld [vmem:[%s1039_s7 + $0x8] sm:$0xff]  ;;  %676 = vset.pattern.permute.xlu0 %v726_v7 }
   0x6   :  { %v88_v3 = vunpack.c.l.bf16 %v835_v2  ;;  %v666_v4 = vld [vmem:[%s1038_s6] sm:$0xff]  ;;  %108 = vmatpush.msra.mxu1 %v90_v5  ;;  %677 = vset.pattern.permute.xlu1 %v726_v7 }
   0x7   :  { %v89_v6 = vld [vmem:[%s1039_s7] sm:$0xff]  ;;  %134 = vmatpush.msra.mxu2 %v114_v1  ;;  %80 = vmatpush.bf16.msra.mxu0 %v666_v4 }
   0x8   :  { %v60_v8 = vld [vmem:[%s1035_s3] sm:$0xf]  ;;  %645 = vmatmul.msk.f32.vlgmr.msra.gmra.mxu2 %vm69_vm0, %v88_v3  ;;  %109 = vmatpush.msra.mxu1 %v89_v6 }
   0x9   :  { %v86_v10 = vunpack.c.l.bf16 %v60_v8 }
   0xa   :  { %v176_v9 = vld [vmem:[%s1056_s26] sm:$0xff]  ;;  %v177_v11 = vld [vmem:[%s1056_s26 + $0x8] sm:$0xff] }
   0xb   :  { %644 = vmatmul.msk.f32.vlgmr.msra.gmra.mxu1 %vm69_vm0, %v86_v10  ;;  %194 = vperm.xlu0 %676, %v176_v9  }
   0xc   :  { %24 = vsyncpa [#allocation3], 0  ;;  %643 = vmatmul.msk.bf16.vlgmr.msra.gmra.mxu0 %vm69_vm0, %v60_v8  ;;  %197 = vperm.xlu1 %677, %v177_v11   ;;  %s1057_s28 = sld [smem:[#allocation5_spill]]  ;;  %v144_v14 = vld [vmem:[%s1041_s9 + $0x8] sm:$0xff]  ;;  %v668_v15 = vld [vmem:[%s1037_s5] sm:$0xff]   ;;  %v179_v20 = vlaneseq  ;;  %v727_v24 = vmov 0.0  }
   0xd   :  { %678 = vset.pattern.permute.xlu2 %v726_v7  ;;  %165 = vmatpush.msra.mxu3 %v144_v14  ;;  %v143_v16 = vld [vmem:[%s1041_s9] sm:$0xff]  ;;  %v669_v17 = vunpack.c.l.bf16 %v668_v15  ;;  %v670_v18 = vunpack.c.h.bf16 %v668_v15  ;;  %vm211_vm2 = vcmask 64512   ;;  %v728_v34 = vmov 1   ;;  %s1058_s2 = sld [smem:[#allocation7_spill]]  ;;  %s729_s4 = smov 16  }
   0xe   :  { %v886_v22 = vand.u32 127, %v179_v20  ;;  %vm357_vm8 = vcmask 7168   ;;  %vm528_vm15 = vcmask 261120   ;;  %s626_s3 = sshll.u32 %s1049_s17, 4  ;;  %s627_s3 = int_to_ptr.hbm [resolvable:$true] %s626_s3 }
   0xf   :  { %166 = vmatpush.msra.mxu3 %v143_v16 }
  0x10   :  { %646 = vmatmul.msk.f32.vlgmr.msra.gmra.mxu3 %vm69_vm0, %v669_v17 }
  0x12   :  { %v174_v12 = vld [vmem:[%s1057_s28] sm:$0xff]  ;;  %v175_v13 = vld [vmem:[%s1057_s28 + $0x8] sm:$0xff] }
  0x13   :  { %182 = vperm.xlu0 %676, %v174_v12  }
  0x14   :  { %185 = vperm.xlu1 %677, %v175_v13  }
  0x18   :  { %647 = vmatmul.msk.f32.gmra.mxu3 %vm69_vm0, %v670_v18 }
  0x1b   :  { %679 = vset.pattern.permute.xlu0 %v728_v34 }
  0x1c   :  { %680 = vset.pattern.permute.xlu1 %v728_v34 }
  0x7d   :  { %v881_v19 = vpop.permute.xlu0 %194 }
  0x7e   :  { %v883_v21 = vpop.permute.xlu1 %197  ;;  %vm199_vm3 = vcmp.eq.s32.totalorder %v886_v22, %v881_v19 }
  0x7f   :  { %v899_v30 = vsel %vm199_vm3, 1.0, %v727_v24  ;;  %vm200_vm5 = vcmp.eq.s32.totalorder %v886_v22, %v883_v21 }
  0x80   :  { %v912_v33 = vsel %vm200_vm5, 1.0, %v727_v24 }
  0x85   :  { %v183_v23 = vpop.permute.xlu0 %182 }
  0x86   :  { %vm187_vm1 = vcmp.eq.s32.totalorder %v886_v22, %v183_v23  ;;  %v186_v28 = vpop.permute.xlu1 %185 }
  0x87   :  { %v648_v25 = vsel %vm187_vm1, 1.0, %v727_v24  ;;  %vm188_vm4 = vcmp.eq.s32.totalorder %v886_v22, %v186_v28 }
  0x88   :  { %v111_v26 = vpop.f32.mrf.mxu1  ;;  %v649_v31 = vsel %vm188_vm4, 1.0, %v727_v24 }
  0x89   :  { %v82_v27 = vpop.f32.mrf.mxu0  ;;  %285 = vmatpush.msrb.mxu0 %v111_v26 }
  0x8a   :  { %233 = vmatpush.msrb.mxu1 %v82_v27  ;;  %657 = vmatmul.msk.f32.vlgmr.msrb.gmra.mxu0 %vm211_vm2, %v648_v25 }
  0x8b   :  { %653 = vmatmul.msk.f32.vlgmr.msrb.gmra.mxu1 %vm211_vm2, %v648_v25  ;;  %v136_v29 = vpop.f32.mrf.mxu2 }
  0x8c   :  { %262 = vmatpush.msrb.mxu2 %v136_v29 }
  0x8d   :  { %655 = vmatmul.msk.f32.vlgmr.msrb.gmra.mxu2 %vm211_vm2, %v899_v30 }
  0x91   :  { %v84_v32 = vpop.f32.mrf.mxu0 }
  0x92   :  { %658 = vmatmul.msk.f32.gmra.mxu0 %vm211_vm2, %v649_v31 }
  0x93   :  { %654 = vmatmul.msk.f32.gmra.mxu1 %vm211_vm2, %v649_v31  ;;  %v168_v35 = vpop.f32.mrf.mxu3 }
  0x95   :  { %656 = vmatmul.msk.f32.gmra.mxu2 %vm211_vm2, %v912_v33 }
  0x9b   :  { %v171_v42 = vpop.f32.mrf.mxu3 }
 0x107   :  { %v287_v36 = vpop.f32.mrf.mxu0 }
 0x10f   :  { %v290_v43 = vpop.f32.mrf.mxu0 }
 0x110   :  { %v264_v37 = vpop.f32.mrf.mxu2 }
 0x111   :  { %v288_v38 = vadd.f32 %v287_v36, %v264_v37  ;;  %v206_v37 = vshrl.u32 %v179_v20, 7  ;;  %v235_v20 = vpop.f32.mrf.mxu1 }
 0x113   :  { %v293_v39 = vadd.f32 %v288_v38, %v168_v35  ;;  %v685_v38 = vld [vmem:[%s1058_s2] ss:$0 sm:$0xff] }
 0x114   :  { %vm208_vm9 = vcmp.eq.s32.totalorder %v206_v37, %v685_v38  ;;  %v554_v38 = vld [vmem:[%s1045_s13 + $0x8] sm:$0xff] }
 0x115   :  { %v297_v40 = vmul.f32 0.2, %v293_v39  ;;  %vm295_vm6 = vcmp.gt.f32.partialorder %v293_v39, 0.0  ;;  %576 = vmatpush.msra.mxu0 %v554_v38 }
 0x117   :  { %v299_v41 = vsel %vm295_vm6, %v293_v39, %v297_v40 }
 0x118   :  { %v267_v44 = vpop.f32.mrf.mxu2  ;;  %331 = vperm.xlu0 %679, %v299_v41   ;;  %303 = vperm.xlu2 %678, %v299_v41  }
 0x119   :  { %v291_v45 = vadd.f32 %v290_v43, %v267_v44  ;;  %v238_v43 = vpop.f32.mrf.mxu1 }
 0x11b   :  { %v294_v46 = vadd.f32 %v291_v45, %v171_v42 }
 0x11d   :  { %v298_v47 = vmul.f32 0.2, %v294_v46  ;;  %vm296_vm7 = vcmp.gt.f32.partialorder %v294_v46, 0.0 }
 0x11f   :  { %v300_v48 = vsel %vm296_vm7, %v294_v46, %v298_v47 }
 0x120   :  { %335 = vperm.xlu1 %680, %v300_v48   ;;  %308 = vperm.xlu2 %678, %v300_v48  }
 0x121   :  { %681 = vset.pattern.permute.xlu0 %v726_v7 }
 0x172   :  { %v304_v49 = vpop.permute.xlu2 %303 }
 0x173   :  { %v311_v50 = vsel %vm199_vm3, %v304_v49, -1e+30 }
 0x174   :  { %v313_v53 = vsel %vm211_vm2, %v311_v50, -inf  ;;  %v522_v50 = vld [vmem:[%s1043_s11 + $0x10] sm:$0xff] }
 0x17a   :  { %v309_v51 = vpop.permute.xlu2 %308 }
 0x17b   :  { %v312_v52 = vsel %vm200_vm5, %v309_v51, -1e+30  ;;  %v521_v51 = vld [vmem:[%s1043_s11 + $0x8] sm:$0xff] }
 0x17c   :  { %v314_v54 = vsel %vm211_vm2, %v312_v52, -inf }
 0x17d   :  { %v315_v55 = vmax.f32 %v313_v53, %v314_v54 }
 0x17f   :  { %v316_v56 = vrot.slane %v315_v55, 4 }
 0x181   :  { %v317_v57 = vmax.f32 %v315_v55, %v316_v56 }
 0x183   :  { %v318_v58 = vrot.slane %v317_v57, 2 }
 0x185   :  { %v319_v59 = vmax.f32 %v317_v57, %v318_v58 }
 0x187   :  { %v320_v60 = vrot.slane %v319_v59, 1 }
 0x189   :  { %v321_v61 = vmax.f32 %v319_v59, %v320_v60 }
 0x18a   :  { %v332_v4 = vpop.permute.xlu0 %331 }
 0x18b   :  { %v323_v62 = vmul.f32 %v912_v33, %v321_v61  ;;  %v322_v63 = vmul.f32 %v899_v30, %v321_v61  ;;  %v338_v5 = vsel %vm199_vm3, %v332_v4, -1e+30  ;;  %v686_v4 = vld [vmem:[%s1042_s10] ss:$0 sm:$0xff] }
 0x18c   :  { %v340_v9 = vsel %vm211_vm2, %v338_v5, -inf }
 0x18d   :  { %v327_v0 = vsel %vm211_vm2, %v323_v62, 0.0  ;;  %v324_v1 = vsel %vm211_vm2, %v322_v63, 0.0 }
 0x18e   :  { %328 = vadd.xlane.f32.xlu2 %v327_v0  ;;  %325 = vadd.xlane.f32.xlu0 %v324_v1 }
 0x192   :  { %v336_v6 = vpop.permute.xlu1 %335 }
 0x193   :  { %v339_v8 = vsel %vm200_vm5, %v336_v6, -1e+30  ;;  %vm442_vm5 = vcmask 15360  }
 0x194   :  { %v341_v10 = vsel %vm211_vm2, %v339_v8, -inf }
 0x195   :  { %v342_v11 = vmax.f32 %v340_v9, %v341_v10 }
 0x197   :  { %v343_v12 = vrot.slane %v342_v11, 4 }
 0x199   :  { %v344_v13 = vmax.f32 %v342_v11, %v343_v12 }
 0x19b   :  { %v345_v14 = vrot.slane %v344_v13, 2 }
 0x19d   :  { %v346_v15 = vmax.f32 %v344_v13, %v345_v14 }
 0x19f   :  { %v347_v16 = vrot.slane %v346_v15, 1 }
 0x1a1   :  { %v348_v17 = vmax.f32 %v346_v15, %v347_v16 }
 0x1a3   :  { %v350_v18 = vmul.f32 %v912_v33, %v348_v17  ;;  %v349_v19 = vmul.f32 %v899_v30, %v348_v17 }
 0x1a5   :  { %v354_v23 = vsel %vm211_vm2, %v350_v18, 0.0  ;;  %v351_v21 = vsel %vm211_vm2, %v349_v19, 0.0 }
 0x1a6   :  { %355 = vadd.xlane.f32.xlu1 %v354_v23  ;;  %352 = vadd.xlane.f32.xlu2 %v351_v21 }
 0x201   :  { %v329_v22 = vpop.xlane.xlu2 %328  ;;  %v326_v25 = vpop.xlane.xlu0 %325 }
 0x219   :  { %v356_v26 = vpop.xlane.xlu1 %355  ;;  %v353_v27 = vpop.xlane.xlu2 %352 }
 0x21a   :  { %v359_v28 = vsel %vm357_vm8, %v329_v22, %v356_v26  ;;  %v358_v29 = vsel %vm357_vm8, %v326_v25, %v353_v27 }
 0x21b   :  { %v361_v31 = vsub.f32 %v300_v48, %v359_v28  ;;  %v360_v32 = vsub.f32 %v299_v41, %v358_v29  ;;  %v652_v41 = vsel %vm208_vm9, 1.0, %v727_v24 }
 0x21d   :  { %v364_v35 = vmul.f32 1.442695, %v361_v31  ;;  %v362_v36 = vmul.f32 1.442695, %v360_v32 }
 0x21f   :  { %690 = vpow2.f32 %v364_v35 }
 0x220   :  { %692 = vpow2.f32 %v362_v36 }
 0x225   :  { %v947_v39 = vpop.eup %690 }
 0x226   :  { %v949_v40 = vpop.eup %692  ;;  %460 = vperm.xlu1 %680, %v947_v39   ;;  %452 = vperm.xlu2 %678, %v947_v39  }
 0x227   :  { %383 = vmatpush.msrb.mxu3 %v947_v39  ;;  %447 = vperm.xlu0 %681, %v949_v40  }
 0x229   :  { %384 = vmatpush.msrb.mxu3 %v949_v40 }
 0x22a   :  { %659 = vmatmul.msk.f32.vlgmr.msrb.gmra.mxu3 %vm69_vm0, %v652_v41 }
 0x22e   :  { %682 = vset.pattern.permute.xlu2 %v728_v34  ;;  %683 = vset.pattern.permute.xlu1 %v726_v7 }
 0x22f   :  { %456 = vperm.xlu2 %682, %v949_v40   ;;  %684 = vset.pattern.permute.xlu0 %v728_v34  ;;  %v523_v34 = vld [vmem:[%s1043_s11 + $0x18] sm:$0xff] }
 0x230   :  { %544 = vmatpush.msra.mxu3 %v523_v34  ;;  %v689_v34 = vld [vmem:[%s1048_s16] ss:$0 sm:$0xff] }
 0x232   :  { %545 = vmatpush.msra.mxu3 %v522_v50 }
 0x234   :  { %546 = vmatpush.msra.mxu3 %v521_v51 }
 0x280   :  { %v453_v42 = vpop.permute.xlu2 %452 }
 0x289   :  { %v457_v45 = vpop.permute.xlu2 %456 }
 0x298   :  { %v461_v44 = vpop.permute.xlu1 %460 }
 0x299   :  { %v464_v46 = vsel %vm69_vm0, %v453_v42, %v461_v44  ;;  %v448_v24 = vpop.permute.xlu0 %447  ;;  %v589_v44 = vld [vmem:[%s1047_s15 + $0x10] sm:$0xff] }
 0x29a   :  { %v466_v47 = vmul.f32 %v464_v46, %v238_v43  ;;  %v463_v48 = vsel %vm69_vm0, %v448_v24, %v457_v45  ;;  %v590_v43 = vld [vmem:[%s1047_s15 + $0x18] sm:$0xff]  ;;  %v588_v45 = vld [vmem:[%s1047_s15 + $0x8] sm:$0xff]  ;;  %v688_v46 = vld [vmem:[%s1046_s14] ss:$0 sm:$0xff]  ;;  %s730_s14 = smov [#allocation2]  }
 0x29b   :  { %v465_v49 = vmul.f32 %v463_v48, %v235_v20  ;;  %v587_v48 = vld [vmem:[%s1047_s15] sm:$0xff]  ;;  %s624_s6 = sshll.u32 %s730_s14, 4  ;;  %s625_s6 = int_to_ptr.vmem [resolvable:$true] %s624_s6 }
 0x29c   :  { %481 = vmatpush.msra.mxu2 %v466_v47 }
 0x29e   :  { %482 = vmatpush.msra.mxu2 %v465_v49 }
 0x29f   :  { %662 = vmatmul.msk.f32.vlgmr.msra.gmra.mxu2 %vm69_vm0, %v652_v41  ;;  %v687_v41 = vld [vmem:[%s1044_s12] ss:$0 sm:$0xff] }
 0x2a0   :  { %610 = vmatpush.msrb.mxu2 %v590_v43 }
 0x2a2   :  { %611 = vmatpush.msrb.mxu2 %v589_v44 }
 0x2a4   :  { %612 = vmatpush.msrb.mxu2 %v588_v45 }
 0x2a6   :  { %613 = vmatpush.msrb.mxu2 %v587_v48 }
 0x2ad   :  { %v386_v7 = vpop.f32.mrf.mxu3 }
 0x2ae   :  { %493 = vperm.xlu2 %682, %v386_v7   ;;  %489 = vperm.xlu1 %683, %v386_v7  }
 0x2af   :  { %404 = vmatpush.msra.mxu1 %v386_v7 }
 0x2b0   :  { %660 = vmatmul.msk.f32.vlgmr.msra.gmra.mxu1 %vm211_vm2, %v899_v30  ;;  %v520_v30 = vld [vmem:[%s1043_s11] sm:$0xff] }
 0x2b1   :  { %547 = vmatpush.msra.mxu3 %v520_v30 }
 0x2b8   :  { %661 = vmatmul.msk.f32.gmra.mxu1 %vm211_vm2, %v912_v33 }
 0x308   :  { %v494_v33 = vpop.permute.xlu2 %493 }
 0x320   :  { %v490_v52 = vpop.permute.xlu1 %489 }
 0x321   :  { %v496_v53 = vsel %vm69_vm0, %v490_v52, %v494_v33 }
 0x322   :  { %vm497_vm10 = vcmp.gt.f32.partialorder %v496_v53, 0.0  ;;  %v484_v63 = vpop.f32.mrf.mxu2 }
 0x323   :  { %v498_v54 = vsel %vm497_vm10, %v496_v53, 1.0 }
 0x324   :  { %694 = vrcp.f32 %v498_v54  ;;  %v510_v59 = vand.u32 2147483648, %v498_v54  ;;  %v508_v61 = vand.u32 2147483647, %v498_v54  ;;  %vm504_vm12 = vweird.f32 %v498_v54 }
 0x326   :  { %v511_v0 = vor.u32 1.1754944e-38, %v510_v59  ;;  %vm509_vm14 = vcmp.eq.f32.partialorder %v508_v61, 8.507059e+37 }
 0x32a   :  { %v695_v55 = vpop.eup %694 }
 0x32b   :  { %v500_v56 = vmul.f32 %v695_v55, %v498_v54  ;;  %vm505_vm11 = vweird.f32 %v695_v55 }
 0x32c   :  { %vm506_vm13 = vmor %vm504_vm12, %vm505_vm11 }
 0x32d   :  { %v501_v57 = vsub.f32 1.0, %v500_v56  ;;  %v406_v58 = vpop.f32.mrf.mxu1 }
 0x32e   :  { %696 = vrcp.f32 %v406_v58  ;;  %v423_v13 = vand.u32 2147483648, %v406_v58  ;;  %v421_v15 = vand.u32 2147483647, %v406_v58  ;;  %vm417_vm2 = vweird.f32 %v406_v58 }
 0x32f   :  { %v502_v60 = vmul.f32 %v695_v55, %v501_v57 }
 0x330   :  { %v424_v19 = vor.u32 1.1754944e-38, %v423_v13  ;;  %vm422_vm4 = vcmp.eq.f32.partialorder %v421_v15, 8.507059e+37 }
 0x331   :  { %v503_v62 = vadd.f32 %v695_v55, %v502_v60 }
 0x333   :  { %v507_v1 = vsel %vm506_vm13, %v695_v55, %v503_v62 }
 0x334   :  { %v697_v5 = vpop.eup %696  ;;  %v512_v6 = vsel %vm509_vm14, %v511_v0, %v507_v1 }
 0x335   :  { %v413_v8 = vmul.f32 %v697_v5, %v406_v58  ;;  %v409_v9 = vpop.f32.mrf.mxu1  ;;  %v513_v10 = vmul.f32 %v512_v6, %v484_v63  ;;  %vm418_vm1 = vweird.f32 %v697_v5 }
 0x336   :  { %698 = vrcp.f32 %v409_v9  ;;  %vm419_vm3 = vmor %vm417_vm2, %vm418_vm1  ;;  %v438_v27 = vand.u32 2147483648, %v409_v9  ;;  %v436_v29 = vand.u32 2147483647, %v409_v9  ;;  %vm432_vm7 = vweird.f32 %v409_v9 }
 0x337   :  { %v414_v11 = vsub.f32 1.0, %v413_v8  ;;  %v518_v12 = vadd.f32 %v686_v4, %v513_v10 }
 0x338   :  { %v439_v32 = vor.u32 1.1754944e-38, %v438_v27  ;;  %vm437_vm9 = vcmp.eq.f32.partialorder %v436_v29, 8.507059e+37 }
 0x339   :  { %v415_v14 = vmul.f32 %v697_v5, %v414_v11  ;;  %v519_v16 = vmax.f32 %v518_v12, 0.0 }
 0x33b   :  { %v416_v17 = vadd.f32 %v697_v5, %v415_v14  ;;  %663 = vmatmul.msk.f32.vlgmr.msra.gmra.mxu3 %vm528_vm15, %v519_v16 }
 0x33c   :  { %v699_v18 = vpop.eup %698 }
 0x33d   :  { %v420_v23 = vsel %vm419_vm3, %v697_v5, %v416_v17  ;;  %v428_v21 = vmul.f32 %v699_v18, %v409_v9  ;;  %vm433_vm6 = vweird.f32 %v699_v18 }
 0x33e   :  { %v425_v22 = vsel %vm422_vm4, %v424_v19, %v420_v23  ;;  %vm434_vm8 = vmor %vm432_vm7, %vm433_vm6 }
 0x33f   :  { %v426_v25 = vmul.f32 %v949_v40, %v425_v22  ;;  %v429_v26 = vsub.f32 1.0, %v428_v21  ;;  %v553_v40 = vld [vmem:[%s1045_s13] sm:$0xff] }
 0x340   :  { %577 = vmatpush.msra.mxu0 %v553_v40 }
 0x341   :  { %v430_v28 = vmul.f32 %v699_v18, %v429_v26  ;;  %443 = vst.msk [vmem:[%s1050_s18] sm:$0xff] %vm442_vm5, %v426_v25 }
 0x343   :  { %v431_v31 = vadd.f32 %v699_v18, %v430_v28 }
 0x345   :  { %v435_v35 = vsel %vm434_vm8, %v699_v18, %v431_v31 }
 0x346   :  { %v440_v36 = vsel %vm437_vm9, %v439_v32, %v435_v35 }
 0x347   :  { %v441_v37 = vmul.f32 %v947_v39, %v440_v36 }
 0x349   :  { %444 = vst.msk [vmem:[%s1050_s18 + $0x8] sm:$0xff] %vm442_vm5, %v441_v37 }
 0x3be   :  { %v549_v39 = vpop.f32.mrf.mxu3 }
 0x3bf   :  { %v550_v20 = vadd.f32 %v687_v41, %v549_v39 }
 0x3c1   :  { %v552_v42 = vmax.f32 %v550_v20, 0.0 }
 0x3c3   :  { %664 = vmatmul.msk.f32.vlgmr.msra.gmra.mxu0 %vm69_vm0, %v552_v42 }
 0x440   :  { %v579_v24 = vpop.f32.mrf.mxu0 }
 0x441   :  { %v580_v47 = vadd.f32 %v688_v46, %v579_v24 }
 0x443   :  { %583 = vrot.lane.b32.xlu1 %v580_v47, %s729_s4 }
 0x4b5   :  { %v584_v49 = vpop.permute.xlu1 %583 }
 0x4b6   :  { %v586_v7 = vsel %vm69_vm0, %v88_v3, %v584_v49 }
 0x4b7   :  { %665 = vmatmul.msk.f32.vlgmr.msrb.gmra.mxu2 %vm528_vm15, %v586_v7 }
 0x53a   :  { %v615_v50 = vpop.f32.mrf.mxu2 }
 0x53b   :  { %v616_v51 = vadd.f32 %v689_v34, %v615_v50 }
 0x53d   :  { %618 = vst.msk [vmem:[#allocation2] sm:$0xff] %vm69_vm0, %v616_v51 }
 0x53e   :  { %629 = dma.vmem_to_hbm [thread:$0]  %s625_s6, 128, %s627_s3, [#allocation3]  }
 0x53f   :  { %724 = dma.done.wait [#allocation3], 128  }
 0x540   :  { %725 = vsyncadd [#allocation3], 4294967168 }
 0x541   :  { %638 = vsyncpa [#allocation3], 1 }

</bundles_post_ra>
